<compile_context>
chip_gen: v7x
topology: tpu7x:2x2x1
jax: 0.10.0
libtpu: 0.0.40
codegen_flags: <defaults>
</compile_context>

<pallas_src>
from functools import partial

import jax
import jax.numpy as jnp
from jax.experimental import pallas as pl
from jax.experimental.pallas import tpu as pltpu


def _round8(n: int) -> int:
    return ((n + 7) // 8) * 8


SLAB_WIDTH = 128  # lane-dense slab width


def gcn_kernel(a_ref, x_ref, mask_ref, slab_ref, out_ref, *, F, H, O):
    f32 = jnp.float32
    K1 = 2 * (F + 1)            # fused K for layer 1: [A@x_a | x_a]
    K2 = 2 * (H + 1)            # fused K for layer 2 / heads
    OFF2 = _round8(K1)
    OFF3 = OFF2 + _round8(K2)

    A = a_ref[...]              # [N, N]   dense weighted adjacency (dst, src)
    x_a = x_ref[...]            # [N, F+1] features with trailing ones column
    mask = mask_ref[...]        # [N, 1]

    # Static carve-up of the packed parameter slab (views of one VMEM buffer).
    w1 = slab_ref[0:K1, 0:H + 1]                 # [2F+2, H+1]
    w2 = slab_ref[OFF2:OFF2 + K2, 0:H + 1]       # [2H+2, H+1]
    wh = slab_ref[OFF3:OFF3 + K2, 0:2 * O]       # [2H+2, 2O]  (policy | value)

    # ---- GraphConv layer 1 + ReLU (one fused weight matmul, bias folded) ----
    agg = jnp.dot(A, x_a, preferred_element_type=f32)
    h = jnp.maximum(
        jnp.dot(jnp.concatenate([agg, x_a], axis=-1), w1,
                preferred_element_type=f32), 0.0)        # [N, H+1], col H == 1

    # ---- GraphConv layer 2 + ReLU ----
    agg = jnp.dot(A, h, preferred_element_type=f32)
    h = jnp.maximum(
        jnp.dot(jnp.concatenate([agg, h], axis=-1), w2,
                preferred_element_type=f32), 0.0)        # [N, H+1], col H == 1

    # ---- fused policy + value heads ----
    agg = jnp.dot(A, h, preferred_element_type=f32)
    pv = jnp.dot(jnp.concatenate([agg, h], axis=-1), wh,
                 preferred_element_type=f32)             # [N, 2O]

    # ---- illegal-move masking + softmax over nodes ----
    # torch: p = mask * p.t(); p[p == 0] = -inf; softmax(p, dim=1)
    # In [N, O] layout: per-node mask (broadcast over outputs), softmax over axis 0.
    pv = mask * pv
    p = pv[:, 0:O]
    v = pv[:, O:2 * O]
    # NOTE: faithfully reproduces the torch quirk — any logit that is exactly 0
    # (masked OR genuinely zero) becomes -inf. A fully-masked column gives NaN,
    # exactly as in the reference module.
    p = jnp.where(p == 0.0, -jnp.inf, p)
    m = jnp.max(p, axis=0, keepdims=True)
    e = jnp.exp(p - m)
    denom = jnp.sum(e, axis=0, keepdims=True)
    p = e * pl.reciprocal(denom, approx=True)            # divide on the EUP

    out_ref[...] = jnp.concatenate([p, v], axis=-1)      # [N, 2O]


def _full_spec(shape):
    # One grid step, whole array resident in VMEM.
    return pl.BlockSpec(shape, lambda i, _nd=len(shape): (0,) * _nd)


@partial(jax.jit, static_argnames=("n_features", "hidden", "output_size"))
def gcn_forward(A, x, mask, slab, *, n_features, hidden, output_size):
    N = x.shape[0]
    F, H, O = n_features, hidden, output_size

    # Augment features with a ones column (bias path; self-propagates in-kernel).
    x_a = jnp.concatenate([x, jnp.ones((N, 1), jnp.float32)], axis=-1)
    mask2 = mask.reshape(N, 1).astype(jnp.float32)

    inputs = (A, x_a, mask2, slab)
    out = pl.pallas_call(
        partial(gcn_kernel, F=F, H=H, O=O),
        out_shape=jax.ShapeDtypeStruct((N, 2 * O), jnp.float32),
        grid=(1,),
        in_specs=[_full_spec(a.shape) for a in inputs],
        out_specs=_full_spec((N, 2 * O)),
        compiler_params=pltpu.CompilerParams(dimension_semantics=("arbitrary",)),
    )(*inputs)

    p_no = out[:, 0:O]          # [N, O]
    v_no = out[:, O:2 * O]      # [N, O]
    # torch returns p.t().view(-1), v.t().view(-1)  ([O, N] flattened row-major)
    return p_no.T.reshape(-1), v_no.T.reshape(-1)


def pack_params(params, n_features, hidden, output_size):
    """Pack all weights/biases into one lane-dense f32 slab [rows, 128]."""
    F, H, O = n_features, hidden, output_size
    Hp = H + 1
    K1, K2 = 2 * (F + 1), 2 * (H + 1)
    S1, S2, S3 = _round8(K1), _round8(K2), _round8(K2)
    assert max(Hp, 2 * O) <= SLAB_WIDTH

    slab = jnp.zeros((S1 + S2 + S3, SLAB_WIDTH), jnp.float32)

    # layer 1: rows [wr1; 0 (deg kill); wo1; b1|1]
    w1 = jnp.zeros((K1, Hp), jnp.float32)
    w1 = w1.at[0:F, 0:H].set(params["wr1"])
    w1 = w1.at[F + 1:2 * F + 1, 0:H].set(params["wo1"])
    w1 = w1.at[2 * F + 1, 0:H].set(params["b1"])
    w1 = w1.at[2 * F + 1, H].set(1.0)               # ones-column self-propagation
    slab = slab.at[0:K1, 0:Hp].set(w1)

    # layer 2: rows [wr2; 0; wo2; b2|1]
    w2 = jnp.zeros((K2, Hp), jnp.float32)
    w2 = w2.at[0:H, 0:H].set(params["wr2"])
    w2 = w2.at[H + 1:2 * H + 1, 0:H].set(params["wo2"])
    w2 = w2.at[2 * H + 1, 0:H].set(params["b2"])
    w2 = w2.at[2 * H + 1, H].set(1.0)
    slab = slab.at[S1:S1 + K2, 0:Hp].set(w2)

    # fused heads: cols [policy | value], rows [wr*; 0; wo*; b*]
    wh = jnp.zeros((K2, 2 * O), jnp.float32)
    wh = wh.at[0:H, 0:O].set(params["wrp"])
    wh = wh.at[0:H, O:2 * O].set(params["wrv"])
    wh = wh.at[H + 1:2 * H + 1, 0:O].set(params["wop"])
    wh = wh.at[H + 1:2 * H + 1, O:2 * O].set(params["wov"])
    wh = wh.at[2 * H + 1, 0:O].set(params["bp"])
    wh = wh.at[2 * H + 1, O:2 * O].set(params["bv"])
    slab = slab.at[S1 + S2:S1 + S2 + K2, 0:2 * O].set(wh)

    return slab


def init_params(key, n_features, hidden, output_size):
    ks = jax.random.split(key, 12)
    s = 0.1

    def w(k, shape):
        return (s * jax.random.normal(k, shape)).astype(jnp.float32)

    return {
        "wr1": w(ks[0], (n_features, hidden)),
        "wo1": w(ks[1], (n_features, hidden)),
        "b1":  w(ks[2], (hidden,)),
        "wr2": w(ks[3], (hidden, hidden)),
        "wo2": w(ks[4], (hidden, hidden)),
        "b2":  w(ks[5], (hidden,)),
        "wrp": w(ks[6], (hidden, output_size)),
        "wop": w(ks[7], (hidden, output_size)),
        "bp":  w(ks[8], (output_size,)),
        "wrv": w(ks[9], (hidden, output_size)),
        "wov": w(ks[10], (hidden, output_size)),
        "bv":  w(ks[11], (output_size,)),
    }


def gcn_reference(A, x, mask, params):
    """Pure-JAX reference of the torch forward (for correctness check)."""
    def conv(xin, wr, wo, b):
        return jnp.dot(jnp.dot(A, xin), wr) + jnp.dot(xin, wo) + b
    h = jax.nn.relu(conv(x, params["wr1"], params["wo1"], params["b1"]))
    h = jax.nn.relu(conv(h, params["wr2"], params["wo2"], params["b2"]))
    p = conv(h, params["wrp"], params["wop"], params["bp"])
    v = conv(h, params["wrv"], params["wov"], params["bv"])
    p = mask[:, None] * p
    v = mask[:, None] * v
    p = jnp.where(p == 0.0, -jnp.inf, p)
    p = jax.nn.softmax(p, axis=0)
    return p.T.reshape(-1), v.T.reshape(-1)


if __name__ == "__main__":
    N = 16           # number of graph nodes
    n_features = 4
    hidden = 32
    output_size = 2
    current_node = 0

    key = jax.random.PRNGKey(0)
    k_feat, k_edge, k_params = jax.random.split(key, 3)

    # Deterministic small graph: bidirectional ring + a few extra directed edges.
    src = jnp.array([i for i in range(N)] + [(i + 1) % N for i in range(N)] + [0, 0, 3],
                    dtype=jnp.int32)
    dst = jnp.array([(i + 1) % N for i in range(N)] + [i for i in range(N)] + [5, 9, 12],
                    dtype=jnp.int32)
    E = src.shape[0]
    edge_attr = jax.random.uniform(k_edge, (E,), minval=0.5, maxval=1.5).astype(jnp.float32)

    # Dense weighted adjacency (A[dst, src] = edge weight) — glue, built once.
    A = jnp.zeros((N, N), jnp.float32).at[dst, src].add(edge_attr)

    # illegal_moves_mask: 1 for nodes directly reachable from current_node.
    mask = jnp.zeros((N,), jnp.float32).at[dst].max(
        jnp.where(src == current_node, 1.0, 0.0))

    x = jax.random.normal(k_feat, (N, n_features)).astype(jnp.float32)
    params = init_params(k_params, n_features, hidden, output_size)
    slab = pack_params(params, n_features, hidden, output_size)   # packed once

    p_flat, v_flat = gcn_forward(A, x, mask, slab,
                                 n_features=n_features, hidden=hidden,
                                 output_size=output_size)
    jax.block_until_ready((p_flat, v_flat))

    assert p_flat.shape == (output_size * N,)
    assert v_flat.shape == (output_size * N,)

    # Correctness check against the pure-JAX reference (loose tol: approx recip).
    p_ref, v_ref = gcn_reference(A, x, mask, params)
    assert bool(jnp.allclose(p_flat, p_ref, atol=1e-2, rtol=1e-2))
    assert bool(jnp.allclose(v_flat, v_ref, atol=1e-2, rtol=1e-2))

    print("KERNEL_OK")
</pallas_src>

<mosaic_0001>
module attributes {stable_mosaic.version = 11 : i64} {
  func.func @gcn_kernel(%arg0: i32, %arg1: memref<16x16xf32, #tpu.memory_space<vmem>>, %arg2: memref<16x5xf32, #tpu.memory_space<vmem>>, %arg3: memref<16x1xf32, #tpu.memory_space<vmem>>, %arg4: memref<160x128xf32, #tpu.memory_space<vmem>>, %arg5: memref<16x4xf32, #tpu.memory_space<vmem>>) attributes {dimension_semantics = [#tpu.dimension_semantics<arbitrary>], iteration_bounds = array<i64: 1>, scalar_prefetch = 0 : i64, scratch_operands = 0 : i64, tpu.core_type = #tpu.core_type<tc>, window_params = [{pipeline_mode = #tpu.pipeline_mode<synchronous>, transform_indices = @transform_0, window_bounds = array<i64: 16, 16>}, {pipeline_mode = #tpu.pipeline_mode<synchronous>, transform_indices = @transform_1, window_bounds = array<i64: 16, 5>}, {pipeline_mode = #tpu.pipeline_mode<synchronous>, transform_indices = @transform_2, window_bounds = array<i64: 16, 1>}, {pipeline_mode = #tpu.pipeline_mode<synchronous>, transform_indices = @transform_3, window_bounds = array<i64: 160, 128>}, {pipeline_mode = #tpu.pipeline_mode<synchronous>, transform_indices = @transform_4, window_bounds = array<i64: 16, 4>}]} {
    %c0 = arith.constant 0 : index
    %c0_0 = arith.constant 0 : index
    %0 = vector.load %arg1[%c0, %c0_0] : memref<16x16xf32, #tpu.memory_space<vmem>>, vector<16x16xf32>
    %c0_1 = arith.constant 0 : index
    %c0_2 = arith.constant 0 : index
    %1 = vector.load %arg2[%c0_1, %c0_2] : memref<16x5xf32, #tpu.memory_space<vmem>>, vector<16x5xf32>
    %c0_3 = arith.constant 0 : index
    %c0_4 = arith.constant 0 : index
    %2 = vector.load %arg3[%c0_3, %c0_4] : memref<16x1xf32, #tpu.memory_space<vmem>>, vector<16x1xf32>
    %c0_5 = arith.constant 0 : index
    %c0_6 = arith.constant 0 : index
    %3 = vector.load %arg4[%c0_5, %c0_6] : memref<160x128xf32, #tpu.memory_space<vmem>>, vector<10x33xf32>
    %c16 = arith.constant 16 : index
    %c0_7 = arith.constant 0 : index
    %4 = vector.load %arg4[%c16, %c0_7] : memref<160x128xf32, #tpu.memory_space<vmem>>, vector<66x33xf32>
    %c88 = arith.constant 88 : index
    %c0_8 = arith.constant 0 : index
    %5 = vector.load %arg4[%c88, %c0_8] : memref<160x128xf32, #tpu.memory_space<vmem>>, vector<66x4xf32>
    %cst = arith.constant dense<0.000000e+00> : vector<16x5xf32>
    %6 = tpu.matmul %0, %1, %cst {dimension_numbers = #tpu.dot_dimension_numbers<[1], [0], [0], [1], [0, 0, 1, 1], [], []>} : vector<16x16xf32>, vector<16x5xf32>, vector<16x5xf32> -> vector<16x5xf32>
    %7 = tpu.concatenate %6, %1 in 1 : vector<16x5xf32>, vector<16x5xf32> -> vector<16x10xf32>
    %cst_9 = arith.constant dense<0.000000e+00> : vector<16x33xf32>
    %8 = tpu.matmul %7, %3, %cst_9 {dimension_numbers = #tpu.dot_dimension_numbers<[1], [0], [0], [1], [0, 0, 1, 1], [], []>} : vector<16x10xf32>, vector<10x33xf32>, vector<16x33xf32> -> vector<16x33xf32>
    %cst_10 = arith.constant 0.000000e+00 : f32
    %9 = vector.broadcast %cst_10 : f32 to vector<16x33xf32>
    %10 = arith.maximumf %8, %9 : vector<16x33xf32>
    %cst_11 = arith.constant dense<0.000000e+00> : vector<16x33xf32>
    %11 = tpu.matmul %0, %10, %cst_11 {dimension_numbers = #tpu.dot_dimension_numbers<[1], [0], [0], [1], [0, 0, 1, 1], [], []>} : vector<16x16xf32>, vector<16x33xf32>, vector<16x33xf32> -> vector<16x33xf32>
    %12 = tpu.concatenate %11, %10 in 1 : vector<16x33xf32>, vector<16x33xf32> -> vector<16x66xf32>
    %cst_12 = arith.constant dense<0.000000e+00> : vector<16x33xf32>
    %13 = tpu.matmul %12, %4, %cst_12 {dimension_numbers = #tpu.dot_dimension_numbers<[1], [0], [0], [1], [0, 0, 1, 1], [], []>} : vector<16x66xf32>, vector<66x33xf32>, vector<16x33xf32> -> vector<16x33xf32>
    %cst_13 = arith.constant 0.000000e+00 : f32
    %14 = vector.broadcast %cst_13 : f32 to vector<16x33xf32>
    %15 = arith.maximumf %13, %14 : vector<16x33xf32>
    %cst_14 = arith.constant dense<0.000000e+00> : vector<16x33xf32>
    %16 = tpu.matmul %0, %15, %cst_14 {dimension_numbers = #tpu.dot_dimension_numbers<[1], [0], [0], [1], [0, 0, 1, 1], [], []>} : vector<16x16xf32>, vector<16x33xf32>, vector<16x33xf32> -> vector<16x33xf32>
    %17 = tpu.concatenate %16, %15 in 1 : vector<16x33xf32>, vector<16x33xf32> -> vector<16x66xf32>
    %cst_15 = arith.constant dense<0.000000e+00> : vector<16x4xf32>
    %18 = tpu.matmul %17, %5, %cst_15 {dimension_numbers = #tpu.dot_dimension_numbers<[1], [0], [0], [1], [0, 0, 1, 1], [], []>} : vector<16x66xf32>, vector<66x4xf32>, vector<16x4xf32> -> vector<16x4xf32>
    %19 = vector.broadcast %2 : vector<16x1xf32> to vector<16x4xf32>
    %20 = arith.mulf %19, %18 : vector<16x4xf32>
    %21 = vector.extract_strided_slice %20 {offsets = [0, 0], sizes = [16, 2], strides = [1, 1]} : vector<16x4xf32> to vector<16x2xf32>
    %22 = vector.extract_strided_slice %20 {offsets = [0, 2], sizes = [16, 2], strides = [1, 1]} : vector<16x4xf32> to vector<16x2xf32>
    %cst_16 = arith.constant 0.000000e+00 : f32
    %23 = vector.broadcast %cst_16 : f32 to vector<16x2xf32>
    %24 = arith.cmpf oeq, %21, %23 : vector<16x2xf32>
    %cst_17 = arith.constant 0xFF800000 : f32
    %25 = vector.broadcast %cst_17 : f32 to vector<16x2xf32>
    %26 = arith.select %24, %25, %21 : vector<16x2xi1>, vector<16x2xf32>
    %cst_18 = arith.constant dense<0xFF800000> : vector<2xf32>
    %27 = vector.multi_reduction <maximumf>, %26, %cst_18 [0] : vector<16x2xf32> to vector<2xf32>
    %28 = vector.shape_cast %27 : vector<2xf32> to vector<1x2xf32>
    %29 = vector.broadcast %28 : vector<1x2xf32> to vector<16x2xf32>
    %30 = arith.subf %26, %29 : vector<16x2xf32>
    %31 = math.exp %30 : vector<16x2xf32>
    %cst_19 = arith.constant dense<0.000000e+00> : vector<2xf32>
    %32 = vector.multi_reduction <add>, %31, %cst_19 [0] : vector<16x2xf32> to vector<2xf32>
    %33 = vector.shape_cast %32 : vector<2xf32> to vector<1x2xf32>
    %34 = tpu.reciprocal %33 {approx = true} : vector<1x2xf32> -> vector<1x2xf32>
    %35 = vector.broadcast %34 : vector<1x2xf32> to vector<16x2xf32>
    %36 = arith.mulf %31, %35 : vector<16x2xf32>
    %37 = tpu.concatenate %36, %22 in 1 : vector<16x2xf32>, vector<16x2xf32> -> vector<16x4xf32>
    %c0_20 = arith.constant 0 : index
    %c0_21 = arith.constant 0 : index
    %38 = vector.load %arg5[%c0_20, %c0_21] : memref<16x4xf32, #tpu.memory_space<vmem>>, vector<16x4xf32>
    tpu.vector_store %arg5[%c0_20, %c0_21], %37 {strides = array<i32>} : memref<16x4xf32, #tpu.memory_space<vmem>>, vector<16x4xf32>,
    return
  }
  func.func @transform_0(%arg0: i32) -> (i32, i32) {
    %c0_i32 = arith.constant 0 : i32
    %c0_i32_0 = arith.constant 0 : i32
    %c0_i32_1 = arith.constant 0 : i32
    return %c0_i32, %c0_i32_0 : i32, i32
  }
  func.func @transform_1(%arg0: i32) -> (i32, i32) {
    %c0_i32 = arith.constant 0 : i32
    %c0_i32_0 = arith.constant 0 : i32
    %c0_i32_1 = arith.constant 0 : i32
    return %c0_i32, %c0_i32_0 : i32, i32
  }
  func.func @transform_2(%arg0: i32) -> (i32, i32) {
    %c0_i32 = arith.constant 0 : i32
    %c0_i32_0 = arith.constant 0 : i32
    %c0_i32_1 = arith.constant 0 : i32
    return %c0_i32, %c0_i32_0 : i32, i32
  }
  func.func @transform_3(%arg0: i32) -> (i32, i32) {
    %c0_i32 = arith.constant 0 : i32
    %c0_i32_0 = arith.constant 0 : i32
    %c0_i32_1 = arith.constant 0 : i32
    return %c0_i32, %c0_i32_0 : i32, i32
  }
  func.func @transform_4(%arg0: i32) -> (i32, i32) {
    %c0_i32 = arith.constant 0 : i32
    %c0_i32_0 = arith.constant 0 : i32
    %c0_i32_1 = arith.constant 0 : i32
    return %c0_i32, %c0_i32_0 : i32, i32
  }
}

</mosaic_0001>

<bundles_post_ra>
// kernel: gcn_forward.1
= control target key start
LH: loop header
LB: loop body
LE: loop exit
PB: predicated region body
PF: predicated region fallthrough
CT: control target
= control target key end

     0   :  { %9 = vsyncpa [#allocation3], 0  ;;  %s846_s15 = smov [#allocation2]   ;;  %s948_s0 = inlined_call_operand.vmem [shape: f32[16,16], index: 0, kind: input, shape index: {}]   ;;  %s949_s1 = inlined_call_operand.vmem [shape: f32[16,5], index: 1, kind: input, shape index: {}]   ;;  %s950_s2 = inlined_call_operand.vmem [shape: f32[16,1], index: 2, kind: input, shape index: {}]   ;;  %s951_s3 = inlined_call_operand.hbm [shape: f32[160,128], index: 3, kind: input, shape index: {}]   ;;  %s952_s4 = inlined_call_operand.vmem [shape: f32[16,4], index: 4, kind: output, shape index: {}]  }
   0x1   :  { %s21_s16 = sshll.u32 %s846_s15, 4  ;;  %s822_s19 = scalar_lea.hbm %s951_s3, 2560  ;;  %s22_s16 = int_to_ptr.vmem [resolvable:$true] %s21_s16 }
   0x2   :  { %p823_p0 = scmp.ne.s32.totalorder %s951_s3, %s822_s19  ;;  %p826_p1 = scmp.lt.u32.totalorder %s822_s19, %s951_s3 }
   0x4   :  { %p828_p2 = pnand %p826_p1, %p823_p0 }
   0x6   :  { %831 = shalt.err (!%p828_p2)
}
   0x7   :  { %s832_s24 = scalar_lea.vmem %s22_s16, 2560  ;;  %p837_p4 = scmp.lt.s32.totalorder %s22_s16, %s22_s16 }
   0x8   :  { %p833_p3 = scmp.ne.s32.totalorder %s22_s16, %s832_s24  ;;  %p838_p5 = scmp.lt.s32.totalorder %s832_s24, %s832_s24 }
   0xa   :  { %p839_p6 = por %p838_p5, %p837_p4 }
   0xc   :  { %p840_p7 = pnand %p839_p6, %p833_p3 }
   0xe   :  { %843 = shalt.err (!%p840_p7)
}
   0xf   :  { %s847_s25 = smov 128   ;;  %s848_s26 = smov 8  }
  0x10   :  { %27 = dma.hbm_to_vmem [thread:$0]  %s951_s3, 2560, %s22_s16, [#allocation3], %s847_s25, %s847_s25, %s848_s26  }
  0x11   :  { %844 = dma.done.wait [#allocation3], 2560  }
  0x12   :  { %845 = vsyncadd [#allocation3], 4294964736  ;;  %vm57_vm0 = vcmask 130048   ;;  %v33_v0 = vld [vmem:[%s949_s1] sm:$0xff]  ;;  %v34_v1 = vld [vmem:[%s949_s1 + $0x8] sm:$0xff]  ;;  %s849_s9 = smov 5  }
  0x13   :  { %v31_v2 = vld [vmem:[%s948_s0] sm:$0xff]  ;;  %v757_v3 = vpack.c.bf16 %v34_v1, %v33_v0  ;;  %141 = vrot.lane.b32.xlu0 %v33_v0, %s849_s9  ;;  %v904_v4 = vld [vmem:[%s948_s0 + $0x8] sm:$0xff]  ;;  %vm157_vm1 = vcmask 1041408   ;;  %vm850_vm2 = vmmov 1   ;;  %vm147_vm4 = vcmask 39936   ;;  %v39_v14 = vld [vmem:[#allocation2 + $0x10] sm:$0xff] }
  0x14   :  { %691 = vmatprep.mubr.msk.f32.mxu1 %vm57_vm0, %v31_v2  ;;  %705 = vmatprep.mubr.msk.f32.mxu0 %vm57_vm0, %v31_v2  ;;  %v37_v5 = vld [vmem:[#allocation2] sm:$0xff]  ;;  %v38_v6 = vld [vmem:[#allocation2 + $0x8] sm:$0x3]  ;;  %vm762_vm3 = vmpackc.low %vm157_vm1, %vm850_vm2  ;;  %vm150_vm5 = vcmask 80896   ;;  %s851_s0 = smov 33   ;;  %vm321_vm6 = vcmask 269312  }
  0x15   :  { %758 = vmatprep.subr.bf16.mxu1 %v757_v3  ;;  %v761_v7 = vpack.c.bf16 %v38_v6, %v37_v5  ;;  %v40_v15 = vld [vmem:[#allocation2 + $0x18] sm:$0xff]  ;;  %v41_v16 = vld [vmem:[#allocation2 + $0x20] sm:$0xff]  ;;  %v42_v18 = vld [vmem:[#allocation2 + $0x28] sm:$0xff]  ;;  %vm324_vm7 = vcmask 539648   ;;  %v852_v58 = vmov 0   ;;  %vm596_vm8 = vcmask 15360  }
  0x16   :  { %760 = vmatpush3.bf16.msra.mxu1 %v757_v3  ;;  %v771_v17 = vpack.c.bf16 %v40_v15, %v39_v14  ;;  %v775_v19 = vpack.c.bf16 %v42_v18, %v41_v16  ;;  %v43_v20 = vld [vmem:[#allocation2 + $0x30] sm:$0xff]  ;;  %v44_v21 = vld [vmem:[#allocation2 + $0x38] sm:$0xff]  ;;  %v45_v24 = vld [vmem:[#allocation2 + $0x40] sm:$0xff]  ;;  %815 = vset.pattern.permute.xlu1 %v852_v58  ;;  %vm626_vm11 = vcmask 31744  }
  0x17   :  { %143 = vrot.lane.b32.xlu0 %v34_v1, %s849_s9  ;;  %763 = vmatprep.subr.msk.bf16.mxu1 %vm762_vm3, %v761_v7  ;;  %v779_v22 = vpack.c.bf16 %v44_v21, %v43_v20  ;;  %v46_v25 = vld [vmem:[#allocation2 + $0x48] sm:$0xff]  ;;  %v47_v31 = vld [vmem:[#allocation2 + $0x50] sm:$0x3]  ;;  %v48_v41 = vld [vmem:[#allocation2 + $0x58] sm:$0xff] }
  0x18   :  { %v783_v29 = vpack.c.bf16 %v46_v25, %v45_v24  ;;  %v49_v42 = vld [vmem:[#allocation2 + $0x60] sm:$0xff]  ;;  %v50_v46 = vld [vmem:[#allocation2 + $0x68] sm:$0xff]  ;;  %v51_v47 = vld [vmem:[#allocation2 + $0x70] sm:$0xff]  ;;  %814 = vset.pattern.permute.xlu0 %v852_v58 }
  0x19   :  { %692 = vmatmul.mubr.msk.f32.vlgmr.msra.gmra.mrb[0].mxu1 %vm57_vm0, %v904_v4  ;;  %v791_v45 = vpack.c.bf16 %v49_v42, %v48_v41  ;;  %v795_v48 = vpack.c.bf16 %v51_v47, %v50_v46  ;;  %v52_v49 = vld [vmem:[#allocation2 + $0x78] sm:$0xff]  ;;  %v53_v50 = vld [vmem:[#allocation2 + $0x80] sm:$0xff]  ;;  %v54_v52 = vld [vmem:[#allocation2 + $0x88] sm:$0xff] }
  0x1a   :  { %766 = vmatpush3.bf16.msk.msra.mxu1 %vm762_vm3, %v761_v7  ;;  %v799_v51 = vpack.c.bf16 %v53_v50, %v52_v49  ;;  %v55_v53 = vld [vmem:[#allocation2 + $0x90] sm:$0xff]  ;;  %v56_v55 = vld [vmem:[#allocation2 + $0x98] sm:$0x3]  ;;  %v36_v56 = vld [vmem:[%s950_s2 + $0x8] sm:$0xff] }
  0x1b   :  { %772 = vmatprep.subr.bf16.mxu1 %v771_v17  ;;  %v803_v54 = vpack.c.bf16 %v55_v53, %v54_v52  ;;  %v35_v57 = vld [vmem:[%s950_s2] sm:$0xff] }
  0x85   :  { %v142_v8 = vpop.permute.xlu0 %141 }
  0x89   :  { %v144_v9 = vpop.permute.xlu0 %143 }
  0xec   :  { %v693_v10 = vpop.f32.mrb[0].mxu1 }
  0xed   :  { %v130_v11 = vpop.f32.mrb[1].mxu1  ;;  %v149_v13 = vsel %vm147_vm4, %v693_v10, %v144_v9 }
  0xee   :  { %v148_v12 = vsel %vm147_vm4, %v130_v11, %v142_v8 }
  0xef   :  { %698 = vmatprep.mubr.msk.f32.mxu1 %vm150_vm5, %v148_v12 }
  0xf0   :  { %699 = vmatmul.mubr.msk.f32.vlgmr.msra.gmra.mrb[2].mxu1 %vm150_vm5, %v149_v13 }
  0xf1   :  { %774 = vmatpush3.bf16.msra.mxu1 %v771_v17 }
  0xf2   :  { %776 = vmatprep.subr.bf16.mxu1 %v775_v19 }
  0xf5   :  { %778 = vmatpush3.bf16.msra.mxu1 %v775_v19 }
  0xf6   :  { %780 = vmatprep.subr.bf16.mxu1 %v779_v22 }
  0xf9   :  { %782 = vmatpush3.bf16.msra.mxu1 %v779_v22 }
  0xfa   :  { %784 = vmatprep.subr.bf16.mxu1 %v783_v29 }
  0xfd   :  { %786 = vmatpush3.bf16.msra.mxu1 %v783_v29 }
  0xfe   :  { %724 = vmatprep.subr.msk.mxu1 %vm157_vm1, %v47_v31 }
 0x101   :  { %725 = vmatpush3.msk.msra.mxu1 %vm157_vm1, %v47_v31 }
 0x1c3   :  { %v700_v23 = vpop.f32.mrb[2].mxu1 }
 0x1c4   :  { %v237_v26 = vmax.f32 %v700_v23, 0.0  ;;  %v227_v27 = vpop.f32.mrb[3].mxu1 }
 0x1c5   :  { %v236_v28 = vmax.f32 %v227_v27, 0.0 }
 0x1c7   :  { %315 = vrot.lane.b32.xlu1 %v236_v28, %s851_s0  ;;  %v767_v30 = vpack.c.bf16 %v237_v26, %v236_v28 }
 0x1c9   :  { %768 = vmatprep.subr.bf16.mxu0 %v767_v30 }
 0x1ca   :  { %770 = vmatpush3.bf16.msra.mxu0 %v767_v30 }
 0x1cb   :  { %317 = vrot.lane.b32.xlu1 %v237_v26, %s851_s0 }
 0x1cd   :  { %706 = vmatmul.mubr.msk.f32.vlgmr.msra.gmra.mrb[0].mxu0 %vm57_vm0, %v904_v4 }
 0x1ce   :  { %733 = vmatprep.mubr.msk.f32.mxu0 %vm57_vm0, %v31_v2 }
 0x239   :  { %v316_v32 = vpop.permute.xlu1 %315 }
 0x23d   :  { %v318_v35 = vpop.permute.xlu1 %317 }
 0x2a0   :  { %v707_v33 = vpop.f32.mrb[0].mxu0 }
 0x2a1   :  { %v304_v34 = vpop.f32.mrb[1].mxu0  ;;  %v323_v37 = vsel %vm321_vm6, %v707_v33, %v318_v35 }
 0x2a2   :  { %v322_v36 = vsel %vm321_vm6, %v304_v34, %v316_v32 }
 0x2a3   :  { %726 = vmatprep.mubr.msk.f32.mxu1 %vm324_vm7, %v322_v36 }
 0x2a4   :  { %727 = vmatmul.mubr.msk.f32.vlgmr.msra.gmra.mrb[4].mxu1 %vm324_vm7, %v323_v37 }
 0x377   :  { %v728_v38 = vpop.f32.mrb[4].mxu1 }
 0x378   :  { %v410_v39 = vmax.f32 %v728_v38, 0.0  ;;  %v400_v40 = vpop.f32.mrb[5].mxu1 }
 0x379   :  { %v409_v43 = vmax.f32 %v400_v40, 0.0 }
 0x37a   :  { %490 = vrot.lane.b32.xlu1 %v410_v39, %s851_s0 }
 0x37b   :  { %v787_v44 = vpack.c.bf16 %v410_v39, %v409_v43  ;;  %488 = vrot.lane.b32.xlu0 %v409_v43, %s851_s0 }
 0x37d   :  { %788 = vmatprep.subr.bf16.mxu0 %v787_v44 }
 0x37e   :  { %790 = vmatpush3.bf16.msra.mxu0 %v787_v44  ;;  %587 = vperm.xlu1 %815, %v36_v56  }
 0x37f   :  { %792 = vmatprep.subr.bf16.mxu0 %v791_v45  ;;  %582 = vperm.xlu0 %814, %v35_v57  }
 0x381   :  { %734 = vmatmul.mubr.msk.f32.vlgmr.msra.gmra.mrb[2].mxu0 %vm57_vm0, %v904_v4 }
 0x382   :  { %794 = vmatpush3.bf16.msra.mxu0 %v791_v45 }
 0x383   :  { %796 = vmatprep.subr.bf16.mxu0 %v795_v48 }
 0x386   :  { %798 = vmatpush3.bf16.msra.mxu0 %v795_v48 }
 0x387   :  { %800 = vmatprep.subr.bf16.mxu0 %v799_v51 }
 0x38a   :  { %802 = vmatpush3.bf16.msra.mxu0 %v799_v51 }
 0x38b   :  { %804 = vmatprep.subr.bf16.mxu0 %v803_v54 }
 0x38e   :  { %806 = vmatpush3.bf16.msra.mxu0 %v803_v54 }
 0x38f   :  { %752 = vmatprep.subr.msk.mxu0 %vm157_vm1, %v56_v55 }
 0x392   :  { %753 = vmatpush3.msk.msra.mxu0 %vm157_vm1, %v56_v55 }
 0x3ec   :  { %v491_v62 = vpop.permute.xlu1 %490 }
 0x3ed   :  { %v489_v60 = vpop.permute.xlu0 %488 }
 0x3fd   :  { %v588_v1 = vpop.permute.xlu1 %587 }
 0x3fe   :  { %v583_v2 = vpop.permute.xlu0 %582 }
 0x454   :  { %v735_v59 = vpop.f32.mrb[2].mxu0 }
 0x455   :  { %v477_v61 = vpop.f32.mrb[3].mxu0  ;;  %v495_v0 = vsel %vm321_vm6, %v735_v59, %v491_v62 }
 0x456   :  { %v494_v63 = vsel %vm321_vm6, %v477_v61, %v489_v60 }
 0x457   :  { %754 = vmatprep.mubr.msk.f32.mxu0 %vm324_vm7, %v494_v63 }
 0x458   :  { %755 = vmatmul.mubr.msk.f32.vlgmr.msra.gmra.mrb[4].mxu0 %vm324_vm7, %v495_v0 }
 0x52b   :  { %v756_v3 = vpop.f32.mrb[4].mxu0 }
 0x52c   :  { %v591_v4 = vmul.f32 %v756_v3, %v588_v1  ;;  %v571_v5 = vpop.f32.mrb[5].mxu0 }
 0x52d   :  { %v590_v6 = vmul.f32 %v583_v2, %v571_v5 }
 0x52e   :  { %vm593_vm9 = vcmp.eq.f32.partialorder %v591_v4, 0.0 }
 0x52f   :  { %v595_v7 = vsel %vm593_vm9, -inf, %v591_v4  ;;  %vm592_vm10 = vcmp.eq.f32.partialorder %v590_v6, 0.0 }
 0x530   :  { %v598_v8 = vsel %vm596_vm8, %v595_v7, -inf  ;;  %v594_v9 = vsel %vm592_vm10, -inf, %v590_v6 }
 0x531   :  { %v597_v10 = vsel %vm596_vm8, %v594_v9, -inf }
 0x532   :  { %v599_v11 = vmax.f32 %v597_v10, %v598_v8 }
 0x534   :  { %v600_v12 = vrot.slane %v599_v11, 4 }
 0x536   :  { %v601_v13 = vmax.f32 %v599_v11, %v600_v12 }
 0x538   :  { %v602_v14 = vrot.slane %v601_v13, 2 }
 0x53a   :  { %v603_v15 = vmax.f32 %v601_v13, %v602_v14 }
 0x53c   :  { %v604_v16 = vrot.slane %v603_v15, 1 }
 0x53e   :  { %v605_v17 = vmax.f32 %v603_v15, %v604_v16 }
 0x540   :  { %v606_v18 = vsub.f32 %v594_v9, %v605_v17  ;;  %v607_v19 = vsub.f32 %v595_v7, %v605_v17 }
 0x542   :  { %v608_v20 = vmul.f32 1.442695, %v606_v18  ;;  %v610_v21 = vmul.f32 1.442695, %v607_v19 }
 0x544   :  { %816 = vpow2.f32 %v608_v20 }
 0x545   :  { %818 = vpow2.f32 %v610_v21 }
 0x54e   :  { %v817_v22 = vpop.eup %816 }
 0x54f   :  { %v819_v23 = vpop.eup %818  ;;  %v612_v24 = vsel %vm596_vm8, %v817_v22, 0.0 }
 0x550   :  { %v613_v25 = vsel %vm596_vm8, %v819_v23, 0.0 }
 0x551   :  { %v614_v26 = vadd.f32 %v613_v25, %v612_v24 }
 0x553   :  { %v615_v27 = vrot.slane %v614_v26, 4 }
 0x555   :  { %v616_v28 = vadd.f32 %v615_v27, %v614_v26 }
 0x557   :  { %v617_v29 = vrot.slane %v616_v28, 2 }
 0x559   :  { %v618_v30 = vadd.f32 %v617_v29, %v616_v28 }
 0x55b   :  { %v619_v31 = vrot.slane %v618_v30, 1 }
 0x55d   :  { %v620_v32 = vadd.f32 %v619_v31, %v618_v30 }
 0x55f   :  { %820 = vrcp.f32 %v620_v32 }
 0x569   :  { %v821_v33 = vpop.eup %820 }
 0x56a   :  { %v622_v34 = vmul.f32 %v821_v33, %v817_v22  ;;  %v623_v35 = vmul.f32 %v821_v33, %v819_v23 }
 0x56c   :  { %v624_v36 = vsel %vm596_vm8, %v622_v34, %v590_v6  ;;  %v625_v37 = vsel %vm596_vm8, %v623_v35, %v591_v4 }
 0x56d   :  { %627 = vst.msk [vmem:[%s952_s4] sm:$0xff] %vm626_vm11, %v624_v36  ;;  %628 = vst.msk [vmem:[%s952_s4 + $0x8] sm:$0xff] %vm626_vm11, %v625_v37 }
 0x56e   :  { %633 = vsyncpa [#allocation3], 1 }

</bundles_post_ra>
